<compile_context>
chip_gen: v6e
topology: v6e:2x2x1
jax: 0.10.0
libtpu: 0.0.40
codegen_flags: <defaults>
</compile_context>

<pallas_src>
import jax
import jax.numpy as jnp
from jax.experimental import pallas as pl
from jax.experimental.pallas import tpu as pltpu


def _chomp_copy_kernel(x_ref, o_ref):
    # Pure copy: the chomp is expressed via the BlockSpecs, so the trailing
    # chomp_size columns were never brought into VMEM in the first place.
    o_ref[...] = x_ref[...]


def _round_up(v: int, m: int) -> int:
    return ((v + m - 1) // m) * m


# Per-tile VMEM budget.  in + out, each auto double-buffered => ~4x this resident
# in VMEM (<= 16 MiB), comfortably under the explicit limit below on all of
# v5e / v6e / v7x (v7x physical VMEM is only 64 MiB per TC).
_MAX_TILE_BYTES = 4 * 1024 * 1024
_VMEM_LIMIT_BYTES = 32 * 1024 * 1024


def _choose_tiles(rows: int, l_out: int, itemsize: int):
    """Pick (row_tile, lane_tile, sublane) for the flattened (rows, L) copy."""
    # Sublane quantum depends on dtype packing: 8 (4-byte) / 16 (2-byte) / 32 (1-byte).
    sublane = {4: 8, 2: 16, 1: 32}.get(itemsize, 8)
    rows_al = _round_up(rows, sublane)
    l_full = _round_up(l_out, 128)

    if l_full * sublane * itemsize <= _MAX_TILE_BYTES:
        # Preferred path: full-length lane tile -> contiguous per-row DMA, 1-D grid.
        tl = l_full
        tr = (_MAX_TILE_BYTES // (tl * itemsize) // sublane) * sublane
        tr = max(sublane, min(tr, rows_al))
        # Guarantee >=2 grid steps on the parallel axis when rows allow it,
        # so v7x's 2 TensorCores both get work (no effect on v5e/v6e).
        while tr > sublane and pl.cdiv(rows, tr) < 2:
            tr = max(sublane, _round_up((tr + 1) // 2, sublane))
        return tr, tl, sublane

    # Very long sequences (> ~128K f32 columns): tile the length axis too.
    tl = max(128, (_MAX_TILE_BYTES // (sublane * itemsize) // 128) * 128)
    tl = min(tl, l_full)
    tr = max(sublane, (_MAX_TILE_BYTES // (tl * itemsize) // sublane) * sublane)
    tr = min(tr, rows_al)
    return tr, tl, sublane


def chomp1d(x: jax.Array, chomp_size: int) -> jax.Array:
    """Pallas equivalent of Chomp1d.forward: x[:, :, :-chomp_size].contiguous().

    Note: chomp_size must be > 0.  (PyTorch's x[:, :, :-0] would be an empty
    slice, which is almost certainly not the intent, so we reject it.)
    """
    assert chomp_size > 0, "chomp_size must be positive"
    n, c, l = x.shape
    l_out = l - chomp_size
    assert l_out > 0, "chomp_size must be smaller than the length dimension"

    rows = n * c
    x2 = x.reshape(rows, l)  # free, contiguous: (N, C, L) -> (N*C, L)

    itemsize = jnp.dtype(x.dtype).itemsize
    tr, tl, _ = _choose_tiles(rows, l_out, itemsize)

    # Advisory cost: pure copy, ~2 * rows * l_out bytes of HBM traffic
    # (the chomped tail is never read).
    cost = pl.CostEstimate(
        flops=0,
        transcendentals=0,
        bytes_accessed=2 * rows * l_out * itemsize,
    )

    if tl >= l_out:
        # Full-length lane tile: 1-D grid over row tiles, contiguous output rows.
        grid = (pl.cdiv(rows, tr),)
        in_specs = [pl.BlockSpec((tr, tl), lambda r: (r, 0))]
        out_specs = pl.BlockSpec((tr, tl), lambda r: (r, 0))
        dims = ("parallel",)
    else:
        grid = (pl.cdiv(rows, tr), pl.cdiv(l_out, tl))
        in_specs = [pl.BlockSpec((tr, tl), lambda r, li: (r, li))]
        out_specs = pl.BlockSpec((tr, tl), lambda r, li: (r, li))
        dims = ("parallel", "parallel")

    out2 = pl.pallas_call(
        _chomp_copy_kernel,
        out_shape=jax.ShapeDtypeStruct((rows, l_out), x.dtype),
        grid=grid,
        # Same block shape + index map for input and output: the input window
        # over (rows, L) never covers the chomped tail (beyond the single masked
        # ragged lane edge), so those bytes are never read from HBM.
        in_specs=in_specs,
        out_specs=out_specs,
        compiler_params=pltpu.CompilerParams(
            dimension_semantics=dims,
            vmem_limit_bytes=_VMEM_LIMIT_BYTES,
        ),
        cost_estimate=cost,
    )(x2)

    return out2.reshape(n, c, l_out)


if __name__ == "__main__":
    key = jax.random.PRNGKey(0)
    k1, k2, k3 = jax.random.split(key, 3)

    # Small shapes consistent with a TCN Conv1d activation: (batch, channels, seq_len).
    N, C, L = 2, 4, 16
    chomp_size = 3
    x = jax.random.normal(k1, (N, C, L), dtype=jnp.float32)

    out = jax.block_until_ready(chomp1d(x, chomp_size))
    ref = x[:, :, :-chomp_size]
    assert out.shape == (N, C, L - chomp_size), out.shape
    assert out.dtype == x.dtype
    assert jnp.array_equal(out, ref), "Pallas Chomp1d mismatch vs reference (toy shape)"

    # Exercises a multi-step 1-D grid (>=2 row tiles for v7x) with ragged row
    # and lane edges (masked DMA paths), full-length lane tile.
    x2 = jax.random.normal(k2, (2, 13, 300), dtype=jnp.float32)
    out2 = jax.block_until_ready(chomp1d(x2, 7))
    ref2 = x2[:, :, :-7]
    assert out2.shape == ref2.shape
    assert jnp.array_equal(out2, ref2), "Pallas Chomp1d mismatch vs reference (tiled f32)"

    # bf16 path: 16-row sublane quantum, 2-byte packing.
    x3 = jax.random.normal(k3, (3, 16, 257), dtype=jnp.bfloat16)
    out3 = jax.block_until_ready(chomp1d(x3, 5))
    ref3 = x3[:, :, :-5]
    assert out3.shape == ref3.shape
    assert out3.dtype == jnp.bfloat16
    assert jnp.array_equal(out3, ref3), "Pallas Chomp1d mismatch vs reference (bf16)"

    print("KERNEL_OK")
</pallas_src>

<mosaic_0001>
module attributes {stable_mosaic.version = 11 : i64} {
  func.func @_chomp_copy_kernel(%arg0: i32, %arg1: memref<8x128xf32, #tpu.memory_space<vmem>>, %arg2: memref<8x128xf32, #tpu.memory_space<vmem>>) attributes {dimension_semantics = [#tpu.dimension_semantics<parallel>], iteration_bounds = array<i64: 1>, scalar_prefetch = 0 : i64, scratch_operands = 0 : i64, tpu.core_type = #tpu.core_type<tc>, window_params = [{transform_indices = @transform_0, window_bounds = array<i64: 8, 128>}, {transform_indices = @transform_1, window_bounds = array<i64: 8, 128>}]} {
    %c0 = arith.constant 0 : index
    %c0_0 = arith.constant 0 : index
    %0 = vector.load %arg1[%c0, %c0_0] : memref<8x128xf32, #tpu.memory_space<vmem>>, vector<8x128xf32>
    %c0_1 = arith.constant 0 : index
    %c0_2 = arith.constant 0 : index
    %1 = vector.load %arg2[%c0_1, %c0_2] : memref<8x128xf32, #tpu.memory_space<vmem>>, vector<8x128xf32>
    tpu.vector_store %arg2[%c0_1, %c0_2], %0 {strides = array<i32>} : memref<8x128xf32, #tpu.memory_space<vmem>>, vector<8x128xf32>,
    return
  }
  func.func @transform_0(%arg0: i32) -> (i32, i32) {
    %c0_i32 = arith.constant 0 : i32
    %c0_i32_0 = arith.constant 0 : i32
    return %arg0, %c0_i32 : i32, i32
  }
  func.func @transform_1(%arg0: i32) -> (i32, i32) {
    %c0_i32 = arith.constant 0 : i32
    %c0_i32_0 = arith.constant 0 : i32
    return %arg0, %c0_i32 : i32, i32
  }
}

</mosaic_0001>

<bundles_post_ra>
// kernel: tpu_custom_call.1
= control target key start
LH: loop header
LB: loop body
LE: loop exit
PB: predicated region body
PF: predicated region fallthrough
CT: control target
= control target key end

     0   :  { %6 = vsyncpa [#allocation3], 0  ;;  %s102_s0 = inlined_call_operand.hbm [shape: f32[8,16], index: 0, kind: input, shape index: {}]   ;;  %s103_s1 = inlined_call_operand.hbm [shape: f32[8,13], index: 1, kind: output, shape index: {}]  }
   0x1   :  { %7 = vsyncpa [#allocation4], 0  ;;  %s84_s6 = smov [#allocation2]  }
   0x2   :  { %s14_s7 = sshll.u32 %s84_s6, 4  ;;  %s15_s7 = int_to_ptr.vmem [resolvable:$true] %s14_s7 }
   0x3   :  { %s48_s8 = scalar_lea.vmem %s15_s7, 128  ;;  %p53_p1 = scmp.lt.s32.totalorder %s15_s7, %s15_s7 }
   0x4   :  { %p49_p0 = scmp.ne.s32.totalorder %s15_s7, %s48_s8  ;;  %p54_p2 = scmp.lt.s32.totalorder %s48_s8, %s48_s8 }
   0x6   :  { %p55_p3 = por %p54_p2, %p53_p1 }
   0x8   :  { %p56_p4 = pnand %p55_p3, %p49_p0 }
   0xa   :  { %59 = shalt.err (!%p56_p4)
}
   0xb   :  { %17 = dma.hbm_to_vmem [thread:$0]  %s102_s0, 128, %s15_s7, [#allocation3]  }
   0xc   :  { %80 = dma.done.wait [#allocation3], 128  }
   0xd   :  { %81 = vsyncadd [#allocation3], 4294967168  ;;  %s85_s11 = smov [#allocation5]   ;;  %v21_v0 = vld [vmem:[#allocation2] sm:$0xff] }
   0xe   :  { %s29_s12 = sshll.u32 %s85_s11, 4  ;;  %22 = vst [vmem:[#allocation5] sm:$0xff] %v21_v0  ;;  %s30_s12 = int_to_ptr.vmem [resolvable:$true] %s29_s12 }
   0xf   :  { %s60_s13 = scalar_lea.vmem %s30_s12, 128  ;;  %p65_p6 = scmp.lt.s32.totalorder %s30_s12, %s30_s12 }
  0x10   :  { %p61_p5 = scmp.ne.s32.totalorder %s30_s12, %s60_s13  ;;  %p66_p7 = scmp.lt.s32.totalorder %s60_s13, %s60_s13 }
  0x12   :  { %p67_p8 = por %p66_p7, %p65_p6 }
  0x14   :  { %p68_p9 = pnand %p67_p8, %p61_p5 }
  0x16   :  { %71 = shalt.err (!%p68_p9)
}
  0x17   :  { %32 = dma.vmem_to_hbm [thread:$0]  %s30_s12, 128, %s103_s1, [#allocation4]  }
  0x18   :  { %82 = dma.done.wait [#allocation4], 128  }
  0x19   :  { %83 = vsyncadd [#allocation4], 4294967168 }
  0x1a   :  { %36 = vsyncpa [#allocation3], 1 }
  0x1b   :  { %37 = vsyncpa [#allocation4], 1 }

</bundles_post_ra>
